<compile_context>
chip_gen: v7x
topology: tpu7x:2x2x1
jax: 0.10.0
libtpu: 0.0.40
codegen_flags: <defaults>
</compile_context>

<pallas_src>
import functools

import jax
import jax.numpy as jnp
from jax import lax
from jax.experimental import pallas as pl
from jax.experimental.pallas import tpu as pltpu


def _make_discriminator_kernel(num_layers: int, approx_sigmoid: bool):
    """Kernel closed over the (static) number of hidden layers."""

    def kernel(*refs):
        # refs = (x, wT_0, b_0, ..., wT_{L-1}, b_{L-1}, w_out_row, b_out, o)
        x_ref = refs[0]
        o_ref = refs[-1]
        w_out_ref = refs[1 + 2 * num_layers]   # (1, H)  VMEM
        b_out_ref = refs[2 + 2 * num_layers]   # (1,)    SMEM scalar

        h = None                               # (H, TILE_B) f32 activations
        for i in range(num_layers):
            w = refs[1 + 2 * i][...]           # (out, in)  f32 or bf16
            b = refs[2 + 2 * i][...]           # (out, 1)   f32
            if i == 0:
                # (H, F) . (TILE_B, F)^T -> (H, TILE_B): batch lands on lanes.
                y = lax.dot_general(
                    w, x_ref[...].astype(w.dtype),
                    dimension_numbers=(((1,), (1,)), ((), ())),
                    preferred_element_type=jnp.float32)
            else:
                # Standard (H, H) x (H, TILE_B) matmul, stays lane-dense.
                y = jnp.dot(w, h.astype(w.dtype),
                            preferred_element_type=jnp.float32)
            h = jnp.tanh(y + b)                # f32, fully packed vregs

        # Head: (1, H) x (H, TILE_B) -> (1, TILE_B): lane-dense output row,
        # written with a full-width unmasked store.
        w_row = w_out_ref[...]
        if num_layers == 0:
            z = lax.dot_general(
                w_row, x_ref[...].astype(w_row.dtype),
                dimension_numbers=(((1,), (1,)), ((), ())),
                preferred_element_type=jnp.float32)
        else:
            z = jnp.dot(w_row, h.astype(w_row.dtype),
                        preferred_element_type=jnp.float32)
        z = z + b_out_ref[0]                   # scalar bias from SMEM
        e = jnp.exp(-z)                        # EUP
        o_ref[...] = pl.reciprocal(1.0 + e, approx=approx_sigmoid)

    return kernel


@functools.partial(jax.jit,
                   static_argnames=("num_layers", "use_bf16", "tile_b"))
def discriminator_forward(x, params, *, num_layers, use_bf16=True,
                          tile_b=None):
    """params: flat tuple (w0, b0, ..., w_out, b_out); weights (in, out),
    biases (1, out) (as produced by `init_params`)."""
    batch, feat = x.shape
    if tile_b is None:
        # TILE_B must be a multiple of 128 (lane-dense output row).
        if batch >= 8192:
            tile_b = 1024
        elif batch >= 2048:
            tile_b = 512
        else:
            tile_b = 128
    num_tiles = pl.cdiv(batch, tile_b)
    b_pad = num_tiles * tile_b
    if b_pad != batch:
        x = jnp.pad(x, ((0, b_pad - batch), (0, 0)))

    mm_dtype = jnp.bfloat16 if use_bf16 else jnp.float32

    args = [x]
    in_specs = [pl.BlockSpec((tile_b, feat), lambda i: (i, 0))]
    for l in range(num_layers):
        # Pre-transpose (tiny) weights to (out, in) so in-kernel matmuls are
        # standard-orientation with batch on lanes; biases become (out, 1).
        wt = jnp.transpose(params[2 * l]).astype(mm_dtype)
        bt = params[2 * l + 1].reshape(-1, 1).astype(jnp.float32)
        args += [wt, bt]
        in_specs += [pl.BlockSpec(wt.shape, lambda i: (0, 0)),
                     pl.BlockSpec(bt.shape, lambda i: (0, 0))]
    head_in = params[2 * num_layers].shape[0]
    w_out_row = params[2 * num_layers].reshape(1, head_in).astype(mm_dtype)
    b_out = params[2 * num_layers + 1].reshape((1,)).astype(jnp.float32)
    args += [w_out_row, b_out]
    in_specs += [
        pl.BlockSpec(w_out_row.shape, lambda i: (0, 0)),
        pl.BlockSpec(memory_space=pltpu.MemorySpace.SMEM),   # scalar bias
    ]

    kernel = _make_discriminator_kernel(num_layers, approx_sigmoid=use_bf16)
    out_row = pl.pallas_call(
        kernel,
        out_shape=jax.ShapeDtypeStruct((1, b_pad), jnp.float32),
        grid=(num_tiles,),
        in_specs=in_specs,
        out_specs=pl.BlockSpec((1, tile_b), lambda i: (0, i)),
        compiler_params=pltpu.CompilerParams(
            dimension_semantics=("parallel",)),
    )(*args)
    return out_row.reshape(b_pad, 1)[:batch]


def init_params(key, num_inputs, hidden_size, num_layers):
    """PyTorch-style uniform init; weights stored (in_features, out_features)."""
    params = []
    in_dim = num_inputs
    for _ in range(num_layers):
        key, kw, kb = jax.random.split(key, 3)
        bound = 1.0 / jnp.sqrt(in_dim)
        w = jax.random.uniform(kw, (in_dim, hidden_size), jnp.float32,
                               -bound, bound)
        b = jax.random.uniform(kb, (1, hidden_size), jnp.float32,
                               -bound, bound)
        params += [w, b]
        in_dim = hidden_size
    key, kw, kb = jax.random.split(key, 3)
    bound = 1.0 / jnp.sqrt(in_dim)
    w_out = jax.random.uniform(kw, (in_dim, 1), jnp.float32, -bound, bound)
    b_out = jax.random.uniform(kb, (1, 1), jnp.float32, -bound, bound)
    params += [w_out, b_out]
    return tuple(params)


def reference_forward(x, params, num_layers):
    h = x
    for i in range(num_layers):
        h = jnp.tanh(h @ params[2 * i] + params[2 * i + 1])
    z = h @ params[2 * num_layers] + params[2 * num_layers + 1]
    return jax.nn.sigmoid(z)


if __name__ == "__main__":
    # Small, module-consistent shapes: state+action dim inputs, 2 tanh layers.
    batch = 300          # exercises a 3-step batch grid (TILE_B=128, pad->384)
    num_inputs = 16
    hidden_size = 32
    num_layers = 2

    key = jax.random.PRNGKey(0)
    key, kx = jax.random.split(key)
    x = jax.random.normal(kx, (batch, num_inputs), jnp.float32)
    params = init_params(key, num_inputs, hidden_size, num_layers)

    ref = reference_forward(x, params, num_layers)

    # f32 matmul path (tight check).
    out_f32 = jax.block_until_ready(
        discriminator_forward(x, params, num_layers=num_layers,
                              use_bf16=False))
    assert out_f32.shape == (batch, 1), out_f32.shape
    err_f32 = float(jnp.max(jnp.abs(out_f32 - ref)))
    assert err_f32 < 1e-4, f"f32 path mismatch, max abs err = {err_f32}"

    # bf16 matmul path (MXU-native on v6e/v7x; loose check).
    out_bf16 = jax.block_until_ready(
        discriminator_forward(x, params, num_layers=num_layers,
                              use_bf16=True))
    err_bf16 = float(jnp.max(jnp.abs(out_bf16 - ref)))
    assert err_bf16 < 5e-2, f"bf16 path mismatch, max abs err = {err_bf16}"

    print("KERNEL_OK")
</pallas_src>

<mosaic_0001>
module attributes {stable_mosaic.version = 11 : i64} {
  func.func @kernel(%arg0: i32, %arg1: memref<128x16xf32, #tpu.memory_space<vmem>>, %arg2: memref<32x16xf32, #tpu.memory_space<vmem>>, %arg3: memref<32x1xf32, #tpu.memory_space<vmem>>, %arg4: memref<32x32xf32, #tpu.memory_space<vmem>>, %arg5: memref<32x1xf32, #tpu.memory_space<vmem>>, %arg6: memref<1x32xf32, #tpu.memory_space<vmem>>, %arg7: memref<1xf32, #tpu.memory_space<smem>>, %arg8: memref<1x128xf32, #tpu.memory_space<vmem>>) attributes {dimension_semantics = [#tpu.dimension_semantics<parallel>], iteration_bounds = array<i64: 3>, scalar_prefetch = 0 : i64, scratch_operands = 0 : i64, tpu.core_type = #tpu.core_type<tc>, window_params = [{transform_indices = @transform_0, window_bounds = array<i64: 128, 16>}, {pipeline_mode = #tpu.pipeline_mode<synchronous>, transform_indices = @transform_1, window_bounds = array<i64: 32, 16>}, {pipeline_mode = #tpu.pipeline_mode<synchronous>, transform_indices = @transform_2, window_bounds = array<i64: 32, 1>}, {pipeline_mode = #tpu.pipeline_mode<synchronous>, transform_indices = @transform_3, window_bounds = array<i64: 32, 32>}, {pipeline_mode = #tpu.pipeline_mode<synchronous>, transform_indices = @transform_4, window_bounds = array<i64: 32, 1>}, {pipeline_mode = #tpu.pipeline_mode<synchronous>, transform_indices = @transform_5, window_bounds = array<i64: 1, 32>}, {transform_indices = @transform_6, window_bounds = array<i64: 1>}, {transform_indices = @transform_7, window_bounds = array<i64: 1, 128>}]} {
    %c0 = arith.constant 0 : index
    %c0_0 = arith.constant 0 : index
    %0 = vector.load %arg2[%c0, %c0_0] : memref<32x16xf32, #tpu.memory_space<vmem>>, vector<32x16xf32>
    %c0_1 = arith.constant 0 : index
    %c0_2 = arith.constant 0 : index
    %1 = vector.load %arg3[%c0_1, %c0_2] : memref<32x1xf32, #tpu.memory_space<vmem>>, vector<32x1xf32>
    %c0_3 = arith.constant 0 : index
    %c0_4 = arith.constant 0 : index
    %2 = vector.load %arg1[%c0_3, %c0_4] : memref<128x16xf32, #tpu.memory_space<vmem>>, vector<128x16xf32>
    %cst = arith.constant dense<0.000000e+00> : vector<32x128xf32>
    %3 = tpu.matmul %0, %2, %cst {dimension_numbers = #tpu.dot_dimension_numbers<[1], [1], [0], [0], [0, 0, 1, 0], [], []>} : vector<32x16xf32>, vector<128x16xf32>, vector<32x128xf32> -> vector<32x128xf32>
    %4 = vector.broadcast %1 : vector<32x1xf32> to vector<32x128xf32>
    %5 = arith.addf %3, %4 : vector<32x128xf32>
    %6 = math.tanh %5 : vector<32x128xf32>
    %c0_5 = arith.constant 0 : index
    %c0_6 = arith.constant 0 : index
    %7 = vector.load %arg4[%c0_5, %c0_6] : memref<32x32xf32, #tpu.memory_space<vmem>>, vector<32x32xf32>
    %c0_7 = arith.constant 0 : index
    %c0_8 = arith.constant 0 : index
    %8 = vector.load %arg5[%c0_7, %c0_8] : memref<32x1xf32, #tpu.memory_space<vmem>>, vector<32x1xf32>
    %cst_9 = arith.constant dense<0.000000e+00> : vector<32x128xf32>
    %9 = tpu.matmul %7, %6, %cst_9 {dimension_numbers = #tpu.dot_dimension_numbers<[1], [0], [0], [1], [0, 0, 1, 1], [], []>} : vector<32x32xf32>, vector<32x128xf32>, vector<32x128xf32> -> vector<32x128xf32>
    %10 = vector.broadcast %8 : vector<32x1xf32> to vector<32x128xf32>
    %11 = arith.addf %9, %10 : vector<32x128xf32>
    %12 = math.tanh %11 : vector<32x128xf32>
    %c0_10 = arith.constant 0 : index
    %c0_11 = arith.constant 0 : index
    %13 = vector.load %arg6[%c0_10, %c0_11] : memref<1x32xf32, #tpu.memory_space<vmem>>, vector<1x32xf32>
    %cst_12 = arith.constant dense<0.000000e+00> : vector<1x128xf32>
    %14 = tpu.matmul %13, %12, %cst_12 {dimension_numbers = #tpu.dot_dimension_numbers<[1], [0], [0], [1], [0, 0, 1, 1], [], []>} : vector<1x32xf32>, vector<32x128xf32>, vector<1x128xf32> -> vector<1x128xf32>
    %c0_13 = arith.constant 0 : index
    %15 = memref.load %arg7[%c0_13] : memref<1xf32, #tpu.memory_space<smem>>
    %16 = vector.broadcast %15 : f32 to vector<1x128xf32>
    %17 = arith.addf %14, %16 : vector<1x128xf32>
    %cst_14 = arith.constant 0.000000e+00 : f32
    %18 = vector.broadcast %cst_14 : f32 to vector<1x128xf32>
    %19 = arith.subf %18, %17 : vector<1x128xf32>
    %20 = math.exp %19 : vector<1x128xf32>
    %cst_15 = arith.constant 1.000000e+00 : f32
    %21 = vector.broadcast %cst_15 : f32 to vector<1x128xf32>
    %22 = arith.addf %21, %20 : vector<1x128xf32>
    %23 = tpu.reciprocal %22 : vector<1x128xf32> -> vector<1x128xf32>
    %c0_16 = arith.constant 0 : index
    %c0_17 = arith.constant 0 : index
    %24 = vector.load %arg8[%c0_16, %c0_17] : memref<1x128xf32, #tpu.memory_space<vmem>>, vector<1x128xf32>
    tpu.vector_store %arg8[%c0_16, %c0_17], %23 {strides = array<i32>} : memref<1x128xf32, #tpu.memory_space<vmem>>, vector<1x128xf32>,
    return
  }
  func.func @transform_0(%arg0: i32) -> (i32, i32) {
    %c0_i32 = arith.constant 0 : i32
    %c0_i32_0 = arith.constant 0 : i32
    return %arg0, %c0_i32 : i32, i32
  }
  func.func @transform_1(%arg0: i32) -> (i32, i32) {
    %c0_i32 = arith.constant 0 : i32
    %c0_i32_0 = arith.constant 0 : i32
    %c0_i32_1 = arith.constant 0 : i32
    return %c0_i32, %c0_i32_0 : i32, i32
  }
  func.func @transform_2(%arg0: i32) -> (i32, i32) {
    %c0_i32 = arith.constant 0 : i32
    %c0_i32_0 = arith.constant 0 : i32
    %c0_i32_1 = arith.constant 0 : i32
    return %c0_i32, %c0_i32_0 : i32, i32
  }
  func.func @transform_3(%arg0: i32) -> (i32, i32) {
    %c0_i32 = arith.constant 0 : i32
    %c0_i32_0 = arith.constant 0 : i32
    %c0_i32_1 = arith.constant 0 : i32
    return %c0_i32, %c0_i32_0 : i32, i32
  }
  func.func @transform_4(%arg0: i32) -> (i32, i32) {
    %c0_i32 = arith.constant 0 : i32
    %c0_i32_0 = arith.constant 0 : i32
    %c0_i32_1 = arith.constant 0 : i32
    return %c0_i32, %c0_i32_0 : i32, i32
  }
  func.func @transform_5(%arg0: i32) -> (i32, i32) {
    %c0_i32 = arith.constant 0 : i32
    %c0_i32_0 = arith.constant 0 : i32
    %c0_i32_1 = arith.constant 0 : i32
    return %c0_i32, %c0_i32_0 : i32, i32
  }
  func.func @transform_6(%arg0: i32) -> i32 {
    %c0_i32 = arith.constant 0 : i32
    %c0_i32_0 = arith.constant 0 : i32
    return %c0_i32 : i32
  }
  func.func @transform_7(%arg0: i32) -> (i32, i32) {
    %c0_i32 = arith.constant 0 : i32
    %c0_i32_0 = arith.constant 0 : i32
    return %c0_i32, %arg0 : i32, i32
  }
}

</mosaic_0001>

<bundles_post_ra>
// kernel: discriminator_forward.1
= control target key start
LH: loop header
LB: loop body
LE: loop exit
PB: predicated region body
PF: predicated region fallthrough
CT: control target
= control target key end

     0   :  { %s1012_s26 = smov 0   ;;  %s1150_s0 = inlined_call_operand.vmem [shape: f32[384,16], index: 0, kind: input, shape index: {}]   ;;  %s1151_s1 = inlined_call_operand.vmem [shape: f32[32,16], index: 1, kind: input, shape index: {}]   ;;  %s1152_s2 = inlined_call_operand.vmem [shape: f32[32,1], index: 2, kind: input, shape index: {}]   ;;  %s1153_s3 = inlined_call_operand.vmem [shape: f32[32,32], index: 3, kind: input, shape index: {}]   ;;  %s1154_s4 = inlined_call_operand.vmem [shape: f32[32,1], index: 4, kind: input, shape index: {}]   ;;  %s1155_s5 = inlined_call_operand.vmem [shape: f32[1,32], index: 5, kind: input, shape index: {}]   ;;  %s1156_s6 = inlined_call_operand.<no memory space> [shape: f32[1], index: 6, kind: input, shape index: {}]   ;;  %s1157_s7 = inlined_call_operand.vmem [shape: f32[1,384], index: 7, kind: output, shape index: {}]  }
   0x1   :  { %12 = sst [smem:[#allocation2]] %s1156_s6 }
   0x2 LB: > { %s1018_s27 = sadd.s32 4294967295, %s963_s26   ;;  %p735_p0 = scmp.ge.s32.totalorder %s963_s26, 1  ;;  %s963_s26 = sphi %s1012_s26, %s18_s26  }
   0x3   : > { %p239_p1 = scmp.lt.s32.totalorder %s963_s26, 4 }
   0x5   : > { %p240_p2 = pnand %p735_p0, %p239_p1 }
   0x6   : > { %s736_s28 = sshll.u32 (!%p240_p2), %s1018_s27, 4  ;;  %vm322_vm0 = vcmask (!%p240_p2), 130048   ;;  %v278_v0 = vld [vmem:[%s1151_s1] sm:$0xff] (!%p240_p2)  ;;  %v965_v1 = vmov (!%p240_p2), 0   ;;  %v284_v3 = vld [vmem:[%s1152_s2 + $0x10] sm:$0xff] (!%p240_p2)  ;;  %v283_v4 = vld [vmem:[%s1152_s2 + $0x8] sm:$0xff] (!%p240_p2) }
   0x7   : > { %243 = sbr.rel (%p240_p2) target bundleno = 798 (0x31e), region = 48  ;;  %p270_p3 = scmp.lt.s32.totalorder (!%p240_p2), %s736_s28, 47  ;;  %830 = vmatprep.mubr.msk.f32.mxu0 (!%p240_p2), %vm322_vm0, %v278_v0  ;;  %935 = vset.pattern.permute.xlu0 (!%p240_p2), %v965_v1  ;;  %v282_v2 = vld [vmem:[%s1152_s2] sm:$0xff] (!%p240_p2)  ;;  %v285_v5 = vld [vmem:[%s1152_s2 + $0x18] sm:$0xff] (!%p240_p2)  ;;  %vm1046_vm1 = vmpackc.low (!%p240_p2), %vm322_vm0, %vm322_vm0  ;;  %vm500_vm2 = vcmask (!%p240_p2), 261120   ;;  %v966_v60 = vmov (!%p240_p2), 0.0|0.0  }
   0x8   : > { %304 = vperm.xlu0 (!%p240_p2), %935, %v282_v2   ;;  %936 = vset.pattern.permute.xlu1 (!%p240_p2), %v965_v1  ;;  %v476_v7 = vld [vmem:[%s1154_s4] sm:$0xff] (!%p240_p2)  ;;  %v477_v13 = vld [vmem:[%s1154_s4 + $0x8] sm:$0xff] (!%p240_p2)  ;;  %v478_v15 = vld [vmem:[%s1154_s4 + $0x10] sm:$0xff] (!%p240_p2)  ;;  %vm967_vm3 = vmmov (!%p240_p2), 0   ;;  %v968_v61 = vmov (!%p240_p2), 0.0   ;;  %s603_s21 = sld [smem:[#allocation2]] (!%p240_p2) }
   0x9   : > { %314 = vperm.xlu1 (!%p240_p2), %936, %v284_v3   ;;  %v479_v16 = vld [vmem:[%s1154_s4 + $0x18] sm:$0xff] (!%p240_p2)  ;;  %v279_v35 = vld [vmem:[%s1151_s1 + $0x8] sm:$0xff] (!%p240_p2)  ;;  %v280_v36 = vld [vmem:[%s1151_s1 + $0x10] sm:$0xff] (!%p240_p2)  ;;  %p275_p4 = scmp.lt.s32.totalorder (!%p240_p2), %s1018_s27, 2 }
   0xa   : > { %v281_v37 = vld [vmem:[%s1151_s1 + $0x18] sm:$0xff] (!%p240_p2)  ;;  %v472_v38 = vld [vmem:[%s1153_s3] sm:$0xff] (!%p240_p2)  ;;  %v473_v57 = vld [vmem:[%s1153_s3 + $0x8] sm:$0xff] (!%p240_p2) }
   0xb   : > { %844 = vmatprep.mubr.msk.f32.mxu1 (!%p240_p2), %vm500_vm2, %v472_v38  ;;  %v474_v58 = vld [vmem:[%s1153_s3 + $0x10] sm:$0xff] (!%p240_p2)  ;;  %v475_v59 = vld [vmem:[%s1153_s3 + $0x18] sm:$0xff] (!%p240_p2) }
   0xc   : > { %309 = vperm.xlu0 (!%p240_p2), %935, %v283_v4  }
   0xd   : > { %319 = vperm.xlu1 (!%p240_p2), %936, %v285_v5  }
   0xe   : > { %s1161_s28 = smov (!%p270_p3, %s736_s28), 47  ;;  %s1163_s27 = smov (!%p275_p4, %s1018_s27), 2 }
   0xf   : > { %s737_s15 = sshll.u32 %s1161_s28, 3  ;;  %s277_s24 = scalar_lea.vmem %s1157_s7, %s1163_s27 }
  0x10   : > { %s1042_s18 = scalar_lea.vmem %s1150_s0, %s737_s15  ;;  %482 = vperm.xlu0 %935, %v476_v7  }
  0x11   : > { %v286_v8 = vld [vmem:[%s1042_s18] sm:$0xff]  ;;  %v287_v9 = vld [vmem:[%s1042_s18 + $0x8] sm:$0xff]  ;;  %v288_v10 = vld [vmem:[%s1042_s18 + $0x10] sm:$0xff]  ;;  %487 = vperm.xlu1 %936, %v477_v13  }
  0x12   : > { %v861_v11 = vpack.c.bf16 %v287_v9, %v286_v8  ;;  %v289_v12 = vld [vmem:[%s1042_s18 + $0x18] sm:$0xff]  ;;  %v290_v17 = vld [vmem:[%s1042_s18 + $0x20] sm:$0xff]  ;;  %v291_v18 = vld [vmem:[%s1042_s18 + $0x28] sm:$0xff] }
  0x13   : > { %v867_v14 = vpack.c.bf16 %v289_v12, %v288_v10  ;;  %v873_v19 = vpack.c.bf16 %v291_v18, %v290_v17  ;;  %v292_v20 = vld [vmem:[%s1042_s18 + $0x30] sm:$0xff]  ;;  %v293_v21 = vld [vmem:[%s1042_s18 + $0x38] sm:$0xff]  ;;  %v294_v23 = vld [vmem:[%s1042_s18 + $0x40] sm:$0xff]  ;;  %v604_v17 = vstv %s603_s21 }
  0x14   : > { %863 = vmatprep.subr.msk.bf16.mxu0 %vm1046_vm1, %v861_v11  ;;  %492 = vperm.xlu0 %935, %v478_v15   ;;  %v879_v22 = vpack.c.bf16 %v293_v21, %v292_v20  ;;  %v295_v24 = vld [vmem:[%s1042_s18 + $0x48] sm:$0xff]  ;;  %v296_v26 = vld [vmem:[%s1042_s18 + $0x50] sm:$0xff]  ;;  %v297_v27 = vld [vmem:[%s1042_s18 + $0x58] sm:$0xff] }
  0x15   : > { %866 = vmatpush3.bf16.xpose.msk.msra.mxu0 %vm1046_vm1, %v861_v11  ;;  %497 = vperm.xlu1 %936, %v479_v16   ;;  %v885_v25 = vpack.c.bf16 %v295_v24, %v294_v23  ;;  %v891_v28 = vpack.c.bf16 %v297_v27, %v296_v26  ;;  %v298_v29 = vld [vmem:[%s1042_s18 + $0x60] sm:$0xff]  ;;  %v299_v30 = vld [vmem:[%s1042_s18 + $0x68] sm:$0xff]  ;;  %v300_v32 = vld [vmem:[%s1042_s18 + $0x70] sm:$0xff] }
  0x16   : > { %869 = vmatprep.subr.msk.bf16.mxu0 %vm1046_vm1, %v867_v14  ;;  %v897_v31 = vpack.c.bf16 %v299_v30, %v298_v29  ;;  %v301_v33 = vld [vmem:[%s1042_s18 + $0x78] sm:$0xff]  ;;  %v602_v16 = vld [vmem:[%s1155_s5] sm:$0x1] }
  0x17   : > { %v903_v34 = vpack.c.bf16 %v301_v33, %v300_v32 }
  0x1d   : > { %872 = vmatpush3.bf16.xpose.msk.msra.mxu0 %vm1046_vm1, %v867_v14 }
  0x1e   : > { %875 = vmatprep.subr.msk.bf16.mxu0 %vm1046_vm1, %v873_v19 }
  0x25   : > { %878 = vmatpush3.bf16.xpose.msk.msra.mxu0 %vm1046_vm1, %v873_v19 }
  0x26   : > { %881 = vmatprep.subr.msk.bf16.mxu0 %vm1046_vm1, %v879_v22 }
  0x2d   : > { %884 = vmatpush3.bf16.xpose.msk.msra.mxu0 %vm1046_vm1, %v879_v22 }
  0x2e   : > { %887 = vmatprep.subr.msk.bf16.mxu0 %vm1046_vm1, %v885_v25 }
  0x35   : > { %890 = vmatpush3.bf16.xpose.msk.msra.mxu0 %vm1046_vm1, %v885_v25 }
  0x36   : > { %893 = vmatprep.subr.msk.bf16.mxu0 %vm1046_vm1, %v891_v28 }
  0x3d   : > { %896 = vmatpush3.bf16.xpose.msk.msra.mxu0 %vm1046_vm1, %v891_v28 }
  0x3e   : > { %899 = vmatprep.subr.msk.bf16.mxu0 %vm1046_vm1, %v897_v31 }
  0x45   : > { %902 = vmatpush3.bf16.xpose.msk.msra.mxu0 %vm1046_vm1, %v897_v31 }
  0x46   : > { %905 = vmatprep.subr.msk.bf16.mxu0 %vm1046_vm1, %v903_v34 }
  0x4d   : > { %908 = vmatpush3.bf16.xpose.msk.msra.mxu0 %vm1046_vm1, %v903_v34 }
  0x54   : > { %831 = vmatmul.mubr.msk.f32.vlgmr.msra.gmra.mrb[0].mxu0 %vm322_vm0, %v279_v35 }
  0x55   : > { %833 = vmatprep.mubr.msk.f32.mxu0 %vm322_vm0, %v280_v36 }
  0x58   : > { %834 = vmatmul.mubr.msk.f32.gmra.mrb[2].mxu0 %vm322_vm0, %v281_v37 }
  0x87   : > { %v305_v39 = vpop.permute.xlu0 %304 }
  0x88   : > { %v315_v40 = vpop.permute.xlu1 %314 }
  0x8b   : > { %v310_v41 = vpop.permute.xlu0 %309 }
  0x8c   : > { %v320_v46 = vpop.permute.xlu1 %319 }
  0x8f   : > { %v483_v63 = vpop.permute.xlu0 %482 }
  0x90   : > { %v488_v62 = vpop.permute.xlu1 %487 }
  0x93   : > { %v493_v6 = vpop.permute.xlu0 %492 }
  0x94   : > { %v498_v4 = vpop.permute.xlu1 %497 }
 0x127   : > { %v832_v42 = vpop.f32.mrb[0].mxu0 }
 0x128   : > { %v455_v43 = vadd.f32 %v832_v42, %v310_v41  ;;  %v449_v44 = vpop.f32.mrb[1].mxu0 }
 0x129   : > { %v450_v45 = vadd.f32 %v449_v44, %v305_v39 }
 0x12a   : > { %937 = vtanh.f32 %v455_v43 }
 0x12b   : > { %939 = vtanh.f32 %v450_v45  ;;  %v835_v47 = vpop.f32.mrb[2].mxu0 }
 0x12c   : > { %v465_v48 = vadd.f32 %v835_v47, %v320_v46  ;;  %v459_v49 = vpop.f32.mrb[3].mxu0 }
 0x12d   : > { %v460_v50 = vadd.f32 %v459_v49, %v315_v40 }
 0x12e   : > { %941 = vtanh.f32 %v465_v48 }
 0x12f   : > { %943 = vtanh.f32 %v460_v50 }
 0x134   : > { %v938_v51 = vpop.eup %937 }
 0x135   : > { %v940_v52 = vpop.eup %939 }
 0x136   : > { %v909_v53 = vpack.c.bf16 %v938_v51, %v940_v52 }
 0x138   : > { %v942_v54 = vpop.eup %941  ;;  %910 = vmatprep.subr.bf16.mxu1 %v909_v53 }
 0x139   : > { %v944_v55 = vpop.eup %943  ;;  %912 = vmatpush3.bf16.msra.mxu1 %v909_v53 }
 0x13a   : > { %v913_v56 = vpack.c.bf16 %v942_v54, %v944_v55 }
 0x13c   : > { %914 = vmatprep.subr.bf16.mxu1 %v913_v56 }
 0x13d   : > { %916 = vmatpush3.bf16.msra.mxu1 %v913_v56 }
 0x13e   : > { %917 = vmatprep.subr.bf16.mxu1 %v966_v60 }
 0x140   : > { %845 = vmatmul.mubr.msk.f32.vlgmr.msra.gmra.mrb[0].mxu1 %vm500_vm2, %v473_v57 }
 0x141   : > { %847 = vmatprep.mubr.msk.f32.mxu1 %vm500_vm2, %v474_v58 }
 0x144   : > { %848 = vmatmul.mubr.msk.f32.gmra.mrb[2].mxu1 %vm500_vm2, %v475_v59 }
 0x145   : > { %858 = vmatprep.mubr.msk.f32.mxu1 %vm967_vm3, %v968_v61 }
 0x213   : > { %v846_v0 = vpop.f32.mrb[0].mxu1 }
 0x214   : > { %v585_v1 = vadd.f32 %v846_v0, %v488_v62  ;;  %v579_v2 = vpop.f32.mrb[1].mxu1 }
 0x215   : > { %v580_v3 = vadd.f32 %v579_v2, %v483_v63 }
 0x216   : > { %945 = vtanh.f32 %v585_v1 }
 0x217   : > { %947 = vtanh.f32 %v580_v3  ;;  %v849_v5 = vpop.f32.mrb[2].mxu1 }
 0x218   : > { %v595_v7 = vadd.f32 %v849_v5, %v498_v4  ;;  %v589_v8 = vpop.f32.mrb[3].mxu1 }
 0x219   : > { %v590_v9 = vadd.f32 %v589_v8, %v493_v6 }
 0x21a   : > { %949 = vtanh.f32 %v595_v7 }
 0x21b   : > { %951 = vtanh.f32 %v590_v9 }
 0x220   : > { %v946_v10 = vpop.eup %945 }
 0x221   : > { %v948_v11 = vpop.eup %947 }
 0x222   : > { %v918_v12 = vpack.c.bf16 %v946_v10, %v948_v11 }
 0x224   : > { %v950_v13 = vpop.eup %949  ;;  %919 = vmatpush3.bf16.msra.mxu1 %v918_v12 }
 0x225   : > { %v952_v14 = vpop.eup %951  ;;  %920 = vmatprep.subr.bf16.mxu1 %v966_v60 }
 0x226   : > { %v921_v15 = vpack.c.bf16 %v950_v13, %v952_v14 }
 0x228   : > { %922 = vmatpush3.bf16.msra.mxu1 %v921_v15 }
 0x22b   : > { %859 = vmatmul.mubr.msk.f32.vlgmr.msra.gmra.mrb[4].mxu1 %vm500_vm2, %v602_v16 }
 0x2fe   : > { %v674_v18 = vpop.f32.mrb[4].mxu1 }
 0x2ff   : > { %v675_v19 = vadd.f32 %v674_v18, %v604_v17  ;;  %v860_v20 = vpop.f32.mrb[5].mxu1 }
 0x301   : > { %v678_v21 = vsub.f32 0.0, %v675_v19 }
 0x303   : > { %v679_v22 = vmul.f32 1.442695, %v678_v21 }
 0x305   : > { %953 = vpow2.f32 %v679_v22 }
 0x30f   : > { %v954_v23 = vpop.eup %953 }
 0x310   : > { %v681_v24 = vadd.f32 1.0, %v954_v23 }
 0x312   : > { %955 = vrcp.f32 %v681_v24 }
 0x31c   : > { %v956_v25 = vpop.eup %955 }
 0x31d   : > { %683 = vst [vmem:[%s277_s24] sm:$0x1] %v956_v25 }
 0x31e PF: > { %s18_s26 = sadd.s32 1, %s963_s26  }
 0x31f   : > { %p15_p5 = scmp.ge.s32.totalorder %s18_s26, 5  }
 0x321   :  { %17 = sbr.rel (!%p15_p5) target bundleno = 2 (0x2), region = 78 }

</bundles_post_ra>
